<compile_context>
chip_gen: v7x
topology: tpu7x:2x2x1
jax: 0.10.0
libtpu: 0.0.40
codegen_flags: <defaults>
</compile_context>

<pallas_src>
from dataclasses import dataclass, replace

import jax
import jax.numpy as jnp
from jax.experimental import pallas as pl
from jax.experimental.pallas import tpu as pltpu


_VMEM = pl.BlockSpec(memory_space=pltpu.MemorySpace.VMEM)


def _pad_rows(x, mult=8):
    """Pad the leading (batch / sublane) axis up to a multiple of `mult`."""
    pad = (-x.shape[0]) % mult
    if pad:
        x = jnp.pad(x, ((0, pad),) + ((0, 0),) * (x.ndim - 1))
    return x


# ----------------------------------------------------------------------------- #
# Pallas kernels
# ----------------------------------------------------------------------------- #
def _linear_kernel(x_ref, w_ref, b_ref, o_ref):
    # x: (N, Din), w: (Din, Dout), b: (1, Dout) -> o: (N, Dout)
    o_ref[...] = (
        jnp.dot(x_ref[...], w_ref[...], preferred_element_type=jnp.float32)
        + b_ref[...]
    ).astype(o_ref.dtype)


def pallas_linear(x, w, b):
    n = x.shape[0]
    x_p = _pad_rows(x)  # full sublanes, unmasked stores
    out = pl.pallas_call(
        _linear_kernel,
        out_shape=jax.ShapeDtypeStruct((x_p.shape[0], w.shape[1]), x.dtype),
        in_specs=[_VMEM] * 3,
        out_specs=_VMEM,
    )(x_p, w, b)
    return out[:n]


def _linear_body_kernel(x_ref, w1_ref, b1_ref, w2_ref, b2_ref, o_ref):
    # Fused 'Linear' branch. x: (B*T, Din) (reshaped wrapper-side, batch-major rows).
    B = o_ref.shape[0]
    TF = w2_ref.shape[0]
    h = jnp.dot(x_ref[...], w1_ref[...], preferred_element_type=jnp.float32) + b1_ref[...]
    h = h.reshape(B, TF)  # tiny in-VMEM relayout, matches torch .view(-1, T*F)
    o_ref[...] = (
        jnp.dot(h, w2_ref[...], preferred_element_type=jnp.float32) + b2_ref[...]
    ).astype(o_ref.dtype)


def pallas_linear_body(x_btd, w1, b1, w2, b2):
    B, T, Din = x_btd.shape
    x_p = _pad_rows(x_btd)                       # (B_pad, T, Din)
    b_pad = x_p.shape[0]
    x2d = x_p.reshape(b_pad * T, Din)            # wrapper-side reshape (free layout change)
    out = pl.pallas_call(
        _linear_body_kernel,
        out_shape=jax.ShapeDtypeStruct((b_pad, w2.shape[1]), x_btd.dtype),
        in_specs=[_VMEM] * 5,
        out_specs=_VMEM,
    )(x2d, w1, b1, w2, b2)
    return out[:B]


def _make_fused_lstm_kernel(n_layers, T, H):
    """Fused multi-layer LSTM + hidden2out kernel (single pallas_call)."""

    def kernel(x_ref, *refs):
        # refs = [w_ih_0, w_hh4_0, b_0, ..., w_ih_{L-1}, w_hh4_{L-1}, b_{L-1},
        #         w_h2o, b_h2o, o_ref]
        o_ref = refs[-1]
        w_h2o_ref, b_h2o_ref = refs[-3], refs[-2]

        B = x_ref.shape[1]
        xin = x_ref[...].reshape(T * B, x_ref.shape[2])   # time-major rows: t*B + b
        outs = []
        for l in range(n_layers):
            w_ih_ref, w_hh_ref, b_ref = refs[3 * l], refs[3 * l + 1], refs[3 * l + 2]

            # Hoisted input projection for the whole sequence: ONE matmul, bias folded in.
            gx = jnp.dot(xin, w_ih_ref[...], preferred_element_type=jnp.float32) + b_ref[...]
            # Pre-slice per gate once (off the serial recurrence path).  Gate order i|f|g|o.
            gxs = [gx[:, k * H:(k + 1) * H] for k in range(4)]
            whh = [w_hh_ref[k] for k in range(4)]          # (H, H) per gate

            h = jnp.zeros((B, H), jnp.float32)
            c = jnp.zeros((B, H), jnp.float32)
            outs = []
            for t in range(T):                             # statically unrolled
                r0 = t * B                                 # sublane-tile aligned row slice
                i = jax.nn.sigmoid(gxs[0][r0:r0 + B]
                                   + jnp.dot(h, whh[0], preferred_element_type=jnp.float32))
                f = jax.nn.sigmoid(gxs[1][r0:r0 + B]
                                   + jnp.dot(h, whh[1], preferred_element_type=jnp.float32))
                g = jnp.tanh(gxs[2][r0:r0 + B]
                             + jnp.dot(h, whh[2], preferred_element_type=jnp.float32))
                o = jax.nn.sigmoid(gxs[3][r0:r0 + B]
                                   + jnp.dot(h, whh[3], preferred_element_type=jnp.float32))
                c = f * c + i * g
                h = o * jnp.tanh(c)
                outs.append(h)
            if l + 1 < n_layers:
                xin = jnp.concatenate(outs, axis=0)        # (T*B, H) time-major

        # Lane-dense (B, T*H) hidden sequence -- exactly the layout hidden2out consumes
        # (lane index t*H + h matches torch's lstm_out.view(-1, T*H)).
        lstm_out = jnp.concatenate(outs, axis=1)
        o_ref[...] = (
            jnp.dot(lstm_out, w_h2o_ref[...], preferred_element_type=jnp.float32)
            + b_h2o_ref[...]
        ).astype(o_ref.dtype)

    return kernel


def pallas_lstm_body(x_btd, layer_params, w_h2o, b_h2o, hidden_dim):
    B, T, Din = x_btd.shape
    H = layer_params[0][1].shape[-1]
    n_layers = len(layer_params)

    x_p = _pad_rows(x_btd)                       # pad batch -> full sublanes
    x_tbd = jnp.transpose(x_p, (1, 0, 2))        # time-major (T, B_pad, Din)

    flat = []
    for (w_ih, w_hh4, b) in layer_params:
        flat += [w_ih, w_hh4, b]

    out = pl.pallas_call(
        _make_fused_lstm_kernel(n_layers, T, H),
        out_shape=jax.ShapeDtypeStruct((x_p.shape[0], hidden_dim), x_btd.dtype),
        in_specs=[_VMEM] * (1 + len(flat) + 2),
        out_specs=_VMEM,
    )(x_tbd, *flat, w_h2o, b_h2o)
    return out[:B]


# ----------------------------------------------------------------------------- #
# Module (parameter setup + glue in plain JAX, hot paths in Pallas)
# ----------------------------------------------------------------------------- #
@dataclass
class Cfg:
    NN_TYPE: str
    INPUT_SIZE: int
    HIDDEN_DIM: int
    BODY_OUT_DIM: int
    SEQ_LEN: int
    LSTM_OUT_DIM: int
    LSTM_NUM_LAYERS: int


def _uniform(key, shape, fan_in):
    k = 1.0 / jnp.sqrt(jnp.float32(fan_in))
    return jax.random.uniform(key, shape, jnp.float32, minval=-k, maxval=k)


class BodyBlockPallas:
    """JAX/Pallas re-implementation of selectivets.model.BodyBlock.forward."""

    def __init__(self, cfg: Cfg, key):
        self.cfg = cfg
        nt = cfg.NN_TYPE
        if nt == "LinearSingleFeature":
            # Semantics match torch's .view(-1, seq_len): assumes INPUT_SIZE == 1.
            k1, k2 = jax.random.split(key, 2)
            self.w = _uniform(k1, (cfg.SEQ_LEN, cfg.HIDDEN_DIM), cfg.SEQ_LEN)
            self.b = _uniform(k2, (1, cfg.HIDDEN_DIM), cfg.SEQ_LEN)
        elif nt == "Linear":
            k1, k2, k3, k4 = jax.random.split(key, 4)
            self.w1 = _uniform(k1, (cfg.INPUT_SIZE, cfg.BODY_OUT_DIM), cfg.INPUT_SIZE)
            self.b1 = _uniform(k2, (1, cfg.BODY_OUT_DIM), cfg.INPUT_SIZE)
            fin2 = cfg.SEQ_LEN * cfg.BODY_OUT_DIM
            self.w2 = _uniform(k3, (fin2, cfg.HIDDEN_DIM), fin2)
            self.b2 = _uniform(k4, (1, cfg.HIDDEN_DIM), fin2)
        elif nt == "LSTM":
            H = cfg.LSTM_OUT_DIM
            keys = jax.random.split(key, 4 * cfg.LSTM_NUM_LAYERS + 2)
            self.lstm_params = []       # kernel form: (w_ih, w_hh_split(4,H,H), b_combined)
            self.lstm_params_ref = []   # reference form: (w_ih, w_hh(H,4H), b_combined)
            for layer in range(cfg.LSTM_NUM_LAYERS):
                din = cfg.INPUT_SIZE if layer == 0 else H
                kk = keys[4 * layer: 4 * layer + 4]
                w_ih = _uniform(kk[0], (din, 4 * H), H)          # stored transposed
                w_hh = _uniform(kk[1], (H, 4 * H), H)            # stored transposed
                b_ih = _uniform(kk[2], (1, 4 * H), H)
                b_hh = _uniform(kk[3], (1, 4 * H), H)
                b = b_ih + b_hh
                # Pre-split recurrent weight per gate -> no lane slicing in the loop.
                w_hh4 = jnp.transpose(w_hh.reshape(H, 4, H), (1, 0, 2))  # (4, H, H)
                self.lstm_params.append((w_ih, w_hh4, b))
                self.lstm_params_ref.append((w_ih, w_hh, b))
            fin = cfg.SEQ_LEN * H
            self.w_h2o = _uniform(keys[-2], (fin, cfg.HIDDEN_DIM), fin)
            self.b_h2o = _uniform(keys[-1], (1, cfg.HIDDEN_DIM), fin)
            # TODO(synk): lasthidden2out exists in the PyTorch module but is dead code
            # w.r.t. forward()'s returned value; omitted.
        else:
            raise ValueError(nt)

    # ------------------------- Pallas forward ------------------------------- #
    def __call__(self, window_of_prices):
        cfg = self.cfg
        nt = cfg.NN_TYPE
        if nt == "LinearSingleFeature":
            x = window_of_prices.reshape(-1, cfg.SEQ_LEN)
            return pallas_linear(x, self.w, self.b)
        elif nt == "Linear":
            return pallas_linear_body(
                window_of_prices, self.w1, self.b1, self.w2, self.b2
            )
        else:  # LSTM: all layers + hidden2out fused into one pallas_call.
            return pallas_lstm_body(
                window_of_prices, self.lstm_params, self.w_h2o, self.b_h2o,
                cfg.HIDDEN_DIM,
            )

    # ------------------------- pure-JAX reference --------------------------- #
    def reference(self, window_of_prices):
        cfg = self.cfg
        nt = cfg.NN_TYPE
        if nt == "LinearSingleFeature":
            x = window_of_prices.reshape(-1, cfg.SEQ_LEN)
            return x @ self.w + self.b
        elif nt == "Linear":
            x = window_of_prices @ self.w1 + self.b1
            x = x.reshape(-1, cfg.SEQ_LEN * cfg.BODY_OUT_DIM)
            return x @ self.w2 + self.b2
        else:
            B, T, _ = window_of_prices.shape
            H = cfg.LSTM_OUT_DIM
            inp = window_of_prices
            for (w_ih, w_hh, b) in self.lstm_params_ref:
                h = jnp.zeros((B, H), jnp.float32)
                c = jnp.zeros((B, H), jnp.float32)
                outs = []
                for t in range(T):
                    g = inp[:, t, :] @ w_ih + h @ w_hh + b
                    i = jax.nn.sigmoid(g[:, :H])
                    f = jax.nn.sigmoid(g[:, H:2 * H])
                    gg = jnp.tanh(g[:, 2 * H:3 * H])
                    o = jax.nn.sigmoid(g[:, 3 * H:])
                    c = f * c + i * gg
                    h = o * jnp.tanh(c)
                    outs.append(h)
                inp = jnp.stack(outs, axis=1)
            lstm_out = inp.reshape(-1, cfg.SEQ_LEN * H)
            return lstm_out @ self.w_h2o + self.b_h2o


# ----------------------------------------------------------------------------- #
if __name__ == "__main__":
    base_cfg = Cfg(
        NN_TYPE="Linear",
        INPUT_SIZE=4,
        HIDDEN_DIM=32,
        BODY_OUT_DIM=16,
        SEQ_LEN=8,
        LSTM_OUT_DIM=16,
        LSTM_NUM_LAYERS=2,
    )
    B = 2
    key = jax.random.PRNGKey(0)
    k_x, k_x1 = jax.random.split(key)
    x_multi = jax.random.normal(k_x, (B, base_cfg.SEQ_LEN, base_cfg.INPUT_SIZE),
                                jnp.float32)
    x_single = jax.random.normal(k_x1, (B, base_cfg.SEQ_LEN, 1), jnp.float32)

    for nn_type in ("LinearSingleFeature", "Linear", "LSTM"):
        cfg = replace(base_cfg, NN_TYPE=nn_type)
        model = BodyBlockPallas(cfg, jax.random.PRNGKey(0))
        xin = x_single if nn_type == "LinearSingleFeature" else x_multi
        out = model(xin)
        out = jax.block_until_ready(out)
        ref = model.reference(xin)
        assert out.shape == (B, cfg.HIDDEN_DIM), (nn_type, out.shape)
        assert jnp.allclose(out, ref, atol=1e-4, rtol=1e-4), nn_type

    print("KERNEL_OK")
</pallas_src>

<mosaic_0001>
module attributes {stable_mosaic.version = 11 : i64} {
  func.func @_linear_kernel(%arg0: memref<8x8xf32, #tpu.memory_space<vmem>>, %arg1: memref<8x32xf32, #tpu.memory_space<vmem>>, %arg2: memref<1x32xf32, #tpu.memory_space<vmem>>, %arg3: memref<8x32xf32, #tpu.memory_space<vmem>>) attributes {dimension_semantics = [], scalar_prefetch = 0 : i64, scratch_operands = 0 : i64, tpu.core_type = #tpu.core_type<tc>} {
    %c0 = arith.constant 0 : index
    %c0_0 = arith.constant 0 : index
    %0 = vector.load %arg0[%c0, %c0_0] : memref<8x8xf32, #tpu.memory_space<vmem>>, vector<8x8xf32>
    %c0_1 = arith.constant 0 : index
    %c0_2 = arith.constant 0 : index
    %1 = vector.load %arg1[%c0_1, %c0_2] : memref<8x32xf32, #tpu.memory_space<vmem>>, vector<8x32xf32>
    %cst = arith.constant dense<0.000000e+00> : vector<8x32xf32>
    %2 = tpu.matmul %0, %1, %cst {dimension_numbers = #tpu.dot_dimension_numbers<[1], [0], [0], [1], [0, 0, 1, 1], [], []>} : vector<8x8xf32>, vector<8x32xf32>, vector<8x32xf32> -> vector<8x32xf32>
    %c0_3 = arith.constant 0 : index
    %c0_4 = arith.constant 0 : index
    %3 = vector.load %arg2[%c0_3, %c0_4] : memref<1x32xf32, #tpu.memory_space<vmem>>, vector<1x32xf32>
    %4 = vector.broadcast %3 : vector<1x32xf32> to vector<8x32xf32>
    %5 = arith.addf %2, %4 : vector<8x32xf32>
    %c0_5 = arith.constant 0 : index
    %c0_6 = arith.constant 0 : index
    %6 = vector.load %arg3[%c0_5, %c0_6] : memref<8x32xf32, #tpu.memory_space<vmem>>, vector<8x32xf32>
    tpu.vector_store %arg3[%c0_5, %c0_6], %5 {strides = array<i32>} : memref<8x32xf32, #tpu.memory_space<vmem>>, vector<8x32xf32>,
    return
  }
}

</mosaic_0001>

<bundles_post_ra>
// kernel: tpu_custom_call.1
= control target key start
LH: loop header
LB: loop body
LE: loop exit
PB: predicated region body
PF: predicated region fallthrough
CT: control target
= control target key end

     0   :  { %8 = vsyncpa [#allocation3], 0  ;;  %s290_s0 = inlined_call_operand.hbm [shape: f32[8,8], index: 0, kind: input, shape index: {}]   ;;  %s291_s1 = inlined_call_operand.hbm [shape: f32[8,32], index: 1, kind: input, shape index: {}]   ;;  %s292_s2 = inlined_call_operand.vmem [shape: f32[1,32], index: 2, kind: input, shape index: {}]   ;;  %s293_s3 = inlined_call_operand.hbm [shape: f32[8,32], index: 3, kind: output, shape index: {}]  }
   0x1   :  { %9 = vsyncpa [#allocation6], 0 }
   0x2   :  { %10 = vsyncpa [#allocation4], 0  ;;  %s226_s12 = smov [#allocation2]   ;;  %s227_s14 = smov [#allocation5]  }
   0x3   :  { %s17_s13 = sshll.u32 %s226_s12, 4  ;;  %s27_s15 = sshll.u32 %s227_s14, 4  ;;  %s18_s13 = int_to_ptr.vmem [resolvable:$true] %s17_s13  ;;  %s28_s15 = int_to_ptr.vmem [resolvable:$true] %s27_s15 }
   0x4   :  { %s154_s18 = scalar_lea.hbm %s290_s0, 128 }
   0x5   :  { %p155_p0 = scmp.ne.s32.totalorder %s290_s0, %s154_s18  ;;  %p158_p1 = scmp.lt.u32.totalorder %s154_s18, %s290_s0 }
   0x7   :  { %p160_p2 = pnand %p158_p1, %p155_p0 }
   0x9   :  { %163 = shalt.err (!%p160_p2)
}
   0xa   :  { %s164_s23 = scalar_lea.vmem %s18_s13, 128  ;;  %p169_p4 = scmp.lt.s32.totalorder %s18_s13, %s18_s13 }
   0xb   :  { %p165_p3 = scmp.ne.s32.totalorder %s18_s13, %s164_s23  ;;  %p170_p5 = scmp.lt.s32.totalorder %s164_s23, %s164_s23 }
   0xd   :  { %p171_p6 = por %p170_p5, %p169_p4 }
   0xf   :  { %p172_p7 = pnand %p171_p6, %p165_p3 }
  0x11   :  { %175 = shalt.err (!%p172_p7)
}
  0x12   :  { %20 = dma.hbm_to_vmem [thread:$0]  %s290_s0, 128, %s18_s13, [#allocation3]  }
  0x13   :  { %s176_s28 = scalar_lea.hbm %s291_s1, 128 }
  0x14   :  { %p177_p8 = scmp.ne.s32.totalorder %s291_s1, %s176_s28  ;;  %p180_p9 = scmp.lt.u32.totalorder %s176_s28, %s291_s1 }
  0x16   :  { %p182_p10 = pnand %p180_p9, %p177_p8 }
  0x18   :  { %185 = shalt.err (!%p182_p10)
}
  0x19   :  { %s186_s6 = scalar_lea.vmem %s28_s15, 128  ;;  %p191_p12 = scmp.lt.s32.totalorder %s28_s15, %s28_s15 }
  0x1a   :  { %p187_p11 = scmp.ne.s32.totalorder %s28_s15, %s186_s6  ;;  %p192_p13 = scmp.lt.s32.totalorder %s186_s6, %s186_s6 }
  0x1c   :  { %p193_p0 = por %p192_p13, %p191_p12 }
  0x1e   :  { %p194_p1 = pnand %p193_p0, %p187_p11 }
  0x20   :  { %197 = shalt.err (!%p194_p1)
}
  0x21   :  { %30 = dma.hbm_to_vmem [thread:$0]  %s291_s1, 128, %s28_s15, [#allocation6]  }
  0x22   :  { %220 = dma.done.wait [#allocation3], 128  }
  0x23   :  { %221 = vsyncadd [#allocation3], 4294967168 }
  0x24   :  { %222 = dma.done.wait [#allocation6], 128  }
  0x25   :  { %223 = vsyncadd [#allocation6], 4294967168  ;;  %v228_v0 = vmov 0.0   ;;  %vm229_vm0 = vmmov 0   ;;  %vm48_vm1 = vcmask 64512   ;;  %v40_v1 = vld [vmem:[#allocation5] sm:$0xff] }
  0x26   :  { %144 = vmatprep.subr.mxu0 %v228_v0  ;;  %146 = vmatprep.mubr.msk.f32.mxu0 %vm229_vm0, %v228_v0  ;;  %v39_v2 = vld [vmem:[#allocation2] sm:$0xff]  ;;  %s230_s10 = smov [#allocation7]   ;;  %vm122_vm2 = vcmask 261120  }
  0x27   :  { %145 = vmatpush3.msra.mxu0 %v40_v1  ;;  %v140_v3 = vld [vmem:[%s292_s2] ss:$0 sm:$0xff]  ;;  %s130_s11 = sshll.u32 %s230_s10, 4  ;;  %s131_s11 = int_to_ptr.vmem [resolvable:$true] %s130_s11 }
  0x28   :  { %147 = vmatmul.mubr.msk.f32.vlgmr.msra.gmra.mrb[0].mxu0 %vm48_vm1, %v39_v2  ;;  %s198_s1 = scalar_lea.vmem %s131_s11, 128  ;;  %p203_p3 = scmp.lt.s32.totalorder %s131_s11, %s131_s11 }
  0x29   :  { %p199_p2 = scmp.ne.s32.totalorder %s131_s11, %s198_s1  ;;  %p204_p4 = scmp.lt.s32.totalorder %s198_s1, %s198_s1 }
  0x2b   :  { %p205_p5 = por %p204_p4, %p203_p3 }
  0x2d   :  { %p206_p6 = pnand %p205_p5, %p199_p2 }
  0xfb   :  { %v118_v4 = vpop.f32.mrb[0].mxu0 }
  0xfc   :  { %v119_v5 = vadd.f32 %v140_v3, %v118_v4  ;;  %v148_v6 = vpop.f32.mrb[1].mxu0 }
  0xfe   :  { %123 = vst.msk [vmem:[#allocation7] sm:$0xff] %vm122_vm2, %v119_v5 }
  0xff   :  { %209 = shalt.err (!%p206_p6)
}
 0x100   :  { %s210_s14 = scalar_lea.hbm %s293_s3, 128 }
 0x101   :  { %p211_p7 = scmp.ne.s32.totalorder %s293_s3, %s210_s14  ;;  %p214_p8 = scmp.lt.u32.totalorder %s210_s14, %s293_s3 }
 0x103   :  { %p216_p9 = pnand %p214_p8, %p211_p7 }
 0x105   :  { %219 = shalt.err (!%p216_p9)
}
 0x106   :  { %133 = dma.vmem_to_hbm [thread:$0]  %s131_s11, 128, %s293_s3, [#allocation4]  }
 0x107   :  { %224 = dma.done.wait [#allocation4], 128  }
 0x108   :  { %225 = vsyncadd [#allocation4], 4294967168 }
 0x109   :  { %137 = vsyncpa [#allocation3], 1 }
 0x10a   :  { %138 = vsyncpa [#allocation6], 1 }
 0x10b   :  { %139 = vsyncpa [#allocation4], 1 }

</bundles_post_ra>
